<compile_context>
chip_gen: v7x
topology: tpu7x:2x2x1
jax: 0.10.0
libtpu: 0.0.40
codegen_flags: <defaults>
</compile_context>

<pallas_src>
import math

import jax
import jax.numpy as jnp
from jax.experimental import pallas as pl
from jax.experimental.pallas import tpu as pltpu


def _round_up(x, m):
    return ((x + m - 1) // m) * m


# ----------------------------------------------------------------------------
# Planning: pick tiles / padding / residency once per (N, f_out) configuration.
# ----------------------------------------------------------------------------
def plan_conv(n, f_out, *, tm_max=256, tk_max=512,
              resident_budget_bytes=24 << 20, adj_dtype=jnp.bfloat16):
    n128 = _round_up(max(n, 1), 128)

    def pick(t_max):
        t = 128
        while t * 2 <= min(t_max, n128):
            t *= 2
        return t

    tm = pick(tm_max)
    tk = pick(tk_max)

    # v7x: keep >= 2 row tiles so both TensorCores are used on the parallel axis.
    if n128 // tm < 2 and tm > 128:
        tm //= 2

    # Avoid padding blow-up for ragged/small N: shrink tiles only while the
    # padding waste is a large fraction (>1/8) of the real graph.
    while max(tm, tk) > 128 and (_round_up(n, max(tm, tk)) - n) * 8 > n:
        if tk >= tm:
            tk //= 2
        else:
            tm //= 2

    n_pad = _round_up(n, max(tm, tk))          # both tm and tk divide n_pad
    f_out_pad = _round_up(f_out, 128)          # lane-dense output blocks

    hn_bytes = n_pad * f_out_pad * 2           # bf16 H_nbr
    resident = hn_bytes <= resident_budget_bytes

    # Rough VMEM budget: double-buffered adj tile + H_nbr (+bufs) + H_self + out.
    vmem = 2 * (tm * tk * 2)
    vmem += hn_bytes if resident else 2 * (tk * f_out_pad * 2)
    vmem += 2 * (tm * f_out_pad * 4) * 2
    vmem_limit = min(max(2 * vmem + (8 << 20), 32 << 20), 48 << 20)

    return dict(n=n, n_pad=n_pad, tm=tm, tk=tk, f_out=f_out,
                f_out_pad=f_out_pad, resident=resident,
                vmem_limit=vmem_limit, adj_dtype=adj_dtype)


def prepare_adjacency(adj, plan):
    """Cast + pad the adjacency ONCE (hoisted out of the per-step forward)."""
    n, n_pad = plan["n"], plan["n_pad"]
    assert adj.shape == (n, n)
    adj = adj.astype(plan["adj_dtype"])
    if n_pad != n:
        adj = jnp.pad(adj, ((0, n_pad - n), (0, n_pad - n)))
    return adj


# ----------------------------------------------------------------------------
# Prologue kernel: per-node feature transforms, one fused 2*f_out-wide matmul.
# ----------------------------------------------------------------------------
def _feature_transform_kernel(x_ref, w_ref, b_ref, hn_ref, hs_ref):
    h = jnp.dot(x_ref[...], w_ref[...], preferred_element_type=jnp.float32)
    f_out_pad = hn_ref.shape[1]
    hn_ref[...] = h[:, :f_out_pad].astype(hn_ref.dtype)       # bf16 neighbor msgs
    hs_ref[...] = h[:, f_out_pad:] + b_ref[...]                # f32 self term


def _feature_transform(x, w_cat, bias2d, *, tm, f_out_pad):
    n_pad, f_in = x.shape
    return pl.pallas_call(
        _feature_transform_kernel,
        out_shape=(
            jax.ShapeDtypeStruct((n_pad, f_out_pad), jnp.bfloat16),  # H_nbr
            jax.ShapeDtypeStruct((n_pad, f_out_pad), jnp.float32),   # H_self
        ),
        grid_spec=pltpu.PrefetchScalarGridSpec(
            num_scalar_prefetch=0,
            grid=(n_pad // tm,),
            in_specs=[
                pl.BlockSpec((tm, f_in), lambda i: (i, 0)),
                pl.BlockSpec((f_in, 2 * f_out_pad), lambda i: (0, 0)),  # resident
                pl.BlockSpec((1, f_out_pad), lambda i: (0, 0)),         # resident
            ],
            out_specs=(
                pl.BlockSpec((tm, f_out_pad), lambda i: (i, 0)),
                pl.BlockSpec((tm, f_out_pad), lambda i: (i, 0)),
            ),
        ),
        compiler_params=pltpu.CompilerParams(
            dimension_semantics=("parallel",),
        ),
    )(x, w_cat, bias2d)


# ----------------------------------------------------------------------------
# Aggregate kernel: out[i] = H_self[i] + sum_k adj[i,k] @ H_nbr[k]
# bf16 adj x bf16 H_nbr fed directly to the MXU, f32 accumulation in the
# resident output block.
# ----------------------------------------------------------------------------
def _make_aggregate_kernel(resident, tk):
    def kernel(adj_ref, hn_ref, hs_ref, out_ref):
        k = pl.program_id(1)

        @pl.when(k == 0)
        def _():
            out_ref[...] = hs_ref[...]          # self term + bias, added once

        if resident:
            start = pl.multiple_of(k * tk, tk)
            hn = hn_ref[pl.ds(start, tk), :]    # slice the VMEM-resident H_nbr
        else:
            hn = hn_ref[...]

        out_ref[...] += jnp.dot(adj_ref[...], hn,
                                preferred_element_type=jnp.float32)
    return kernel


def _aggregate(adj_p, h_nbr, h_self, plan):
    n_pad, tm, tk = plan["n_pad"], plan["tm"], plan["tk"]
    f_out_pad = plan["f_out_pad"]

    if plan["resident"]:
        # Fetched from HBM exactly once; stays resident across the whole grid.
        hn_spec = pl.BlockSpec((n_pad, f_out_pad), lambda i, k: (0, 0))
    else:
        hn_spec = pl.BlockSpec((tk, f_out_pad), lambda i, k: (k, 0))

    # TODO(synk): exploit block-level adjacency sparsity by prefetching per-row
    # nonzero-column-block lists (PrefetchScalarGridSpec scalar prefetch) and a
    # data-dependent adj index_map, skipping all-zero adjacency tiles; and/or
    # fuse the prologue into this kernel with a persistent bf16 H_nbr scratch.
    return pl.pallas_call(
        _make_aggregate_kernel(plan["resident"], tk),
        out_shape=jax.ShapeDtypeStruct((n_pad, f_out_pad), jnp.float32),
        grid_spec=pltpu.PrefetchScalarGridSpec(
            num_scalar_prefetch=0,
            grid=(n_pad // tm, n_pad // tk),
            in_specs=[
                pl.BlockSpec((tm, tk), lambda i, k: (i, k)),          # adj tile
                hn_spec,                                              # H_nbr
                pl.BlockSpec((tm, f_out_pad), lambda i, k: (i, 0)),   # H_self
            ],
            out_specs=pl.BlockSpec((tm, f_out_pad), lambda i, k: (i, 0)),
        ),
        compiler_params=pltpu.CompilerParams(
            dimension_semantics=("parallel", "arbitrary"),
            vmem_limit_bytes=plan["vmem_limit"],
        ),
    )(adj_p, h_nbr, h_self)


# ----------------------------------------------------------------------------
# Forward wrapper (expects a pre-prepared adjacency; prepare it once & reuse).
# ----------------------------------------------------------------------------
def imp_graph_convolution(x, adj_prepared, w_nbr, w_own, bias, plan):
    n, n_pad = plan["n"], plan["n_pad"]
    f_out, f_out_pad = plan["f_out"], plan["f_out_pad"]
    tm = plan["tm"]
    f_in = x.shape[1]
    assert x.shape == (n, f_in)
    assert adj_prepared.shape == (n_pad, n_pad)
    assert adj_prepared.dtype == plan["adj_dtype"]
    assert w_nbr.shape == (f_in, f_out) and w_own.shape == (f_in, f_out)
    assert bias.shape == (f_out,)

    x_p = x.astype(jnp.float32)
    if n_pad != n:
        x_p = jnp.pad(x_p, ((0, n_pad - n), (0, 0)))

    pad_f = f_out_pad - f_out
    w_cat = jnp.concatenate(
        [jnp.pad(w_nbr.astype(jnp.float32), ((0, 0), (0, pad_f))),
         jnp.pad(w_own.astype(jnp.float32), ((0, 0), (0, pad_f)))],
        axis=1)
    bias2d = jnp.pad(bias.astype(jnp.float32), (0, pad_f)).reshape(1, f_out_pad)

    h_nbr, h_self = _feature_transform(x_p, w_cat, bias2d,
                                       tm=tm, f_out_pad=f_out_pad)
    out = _aggregate(adj_prepared, h_nbr, h_self, plan)
    return out[:n, :f_out].astype(x.dtype)


def _xavier_uniform(key, fan_in, fan_out, gain):
    # Matches torch.nn.init.xavier_uniform_(tensor, gain)
    a = gain * math.sqrt(6.0 / (fan_in + fan_out))
    return jax.random.uniform(key, (fan_in, fan_out), jnp.float32, -a, a)


if __name__ == "__main__":
    key = jax.random.PRNGKey(0)
    k_x, k_adj, k_wn, k_wo = jax.random.split(key, 4)

    # N nodes, F_in input features, F_out output features. N=512 gives a
    # (2, 1) aggregate grid (row axis shardable across v7x's 2 TensorCores).
    N, F_IN, F_OUT = 512, 128, 128

    x = jax.random.normal(k_x, (N, F_IN), jnp.float32)
    # symmetric, row-normalized-ish dense adjacency (deterministic)
    a_raw = (jax.random.uniform(k_adj, (N, N)) < 0.1).astype(jnp.float32)
    adj = (a_raw + a_raw.T) * 0.5 + jnp.eye(N, dtype=jnp.float32)
    adj = adj / jnp.sum(adj, axis=1, keepdims=True)

    # Deterministic parameter init mirroring reset_parameters():
    # xavier_uniform_(gain=2.0) for both weights, zeros for bias.
    w_nbr = _xavier_uniform(k_wn, F_IN, F_OUT, gain=2.0)
    w_own = _xavier_uniform(k_wo, F_IN, F_OUT, gain=2.0)
    bias = jnp.zeros((F_OUT,), jnp.float32)

    plan = plan_conv(N, F_OUT)
    adj_p = prepare_adjacency(adj, plan)   # hoisted: do once, reuse every step

    out = imp_graph_convolution(x, adj_p, w_nbr, w_own, bias, plan)
    out = jax.block_until_ready(out)
    assert out.shape == (N, F_OUT)

    # Pure-JAX references.
    hn = x @ w_nbr
    ref_f32 = adj @ hn + x @ w_own + bias
    # Same math the kernel performs (bf16-streamed adj and H_nbr, f32 accum):
    adj_bf = adj.astype(jnp.bfloat16).astype(jnp.float32)
    hn_bf = hn.astype(jnp.bfloat16).astype(jnp.float32)
    ref_bf = adj_bf @ hn_bf + x @ w_own + bias

    err_tight = float(jnp.max(jnp.abs(out - ref_bf)))
    err_loose = float(jnp.max(jnp.abs(out - ref_f32)))
    assert jnp.allclose(out, ref_bf, atol=1e-2, rtol=1e-2), err_tight
    assert jnp.allclose(out, ref_f32, atol=5e-2, rtol=5e-2), err_loose

    print("KERNEL_OK")
</pallas_src>

<mosaic_0001>
module attributes {stable_mosaic.version = 11 : i64} {
  func.func @_feature_transform_kernel(%arg0: i32, %arg1: memref<256x128xf32, #tpu.memory_space<vmem>>, %arg2: memref<128x256xf32, #tpu.memory_space<vmem>>, %arg3: memref<1x128xf32, #tpu.memory_space<vmem>>, %arg4: memref<256x128xbf16, #tpu.memory_space<vmem>>, %arg5: memref<256x128xf32, #tpu.memory_space<vmem>>) attributes {dimension_semantics = [#tpu.dimension_semantics<parallel>], iteration_bounds = array<i64: 2>, scalar_prefetch = 0 : i64, scratch_operands = 0 : i64, tpu.core_type = #tpu.core_type<tc>, window_params = [{transform_indices = @transform_0, window_bounds = array<i64: 256, 128>}, {pipeline_mode = #tpu.pipeline_mode<synchronous>, transform_indices = @transform_1, window_bounds = array<i64: 128, 256>}, {pipeline_mode = #tpu.pipeline_mode<synchronous>, transform_indices = @transform_2, window_bounds = array<i64: 1, 128>}, {transform_indices = @transform_3, window_bounds = array<i64: 256, 128>}, {transform_indices = @transform_4, window_bounds = array<i64: 256, 128>}]} {
    %c0 = arith.constant 0 : index
    %c0_0 = arith.constant 0 : index
    %0 = vector.load %arg1[%c0, %c0_0] : memref<256x128xf32, #tpu.memory_space<vmem>>, vector<256x128xf32>
    %c0_1 = arith.constant 0 : index
    %c0_2 = arith.constant 0 : index
    %1 = vector.load %arg2[%c0_1, %c0_2] : memref<128x256xf32, #tpu.memory_space<vmem>>, vector<128x256xf32>
    %cst = arith.constant dense<0.000000e+00> : vector<256x256xf32>
    %2 = tpu.matmul %0, %1, %cst {dimension_numbers = #tpu.dot_dimension_numbers<[1], [0], [0], [1], [0, 0, 1, 1], [], []>} : vector<256x128xf32>, vector<128x256xf32>, vector<256x256xf32> -> vector<256x256xf32>
    %3 = vector.extract_strided_slice %2 {offsets = [0, 0], sizes = [256, 128], strides = [1, 1]} : vector<256x256xf32> to vector<256x128xf32>
    %4 = arith.truncf %3 : vector<256x128xf32> to vector<256x128xbf16>
    %c0_3 = arith.constant 0 : index
    %c0_4 = arith.constant 0 : index
    %5 = vector.load %arg4[%c0_3, %c0_4] : memref<256x128xbf16, #tpu.memory_space<vmem>>, vector<256x128xbf16>
    tpu.vector_store %arg4[%c0_3, %c0_4], %4 {strides = array<i32>} : memref<256x128xbf16, #tpu.memory_space<vmem>>, vector<256x128xbf16>,
    %6 = vector.extract_strided_slice %2 {offsets = [0, 128], sizes = [256, 128], strides = [1, 1]} : vector<256x256xf32> to vector<256x128xf32>
    %c0_5 = arith.constant 0 : index
    %c0_6 = arith.constant 0 : index
    %7 = vector.load %arg3[%c0_5, %c0_6] : memref<1x128xf32, #tpu.memory_space<vmem>>, vector<1x128xf32>
    %8 = vector.broadcast %7 : vector<1x128xf32> to vector<256x128xf32>
    %9 = arith.addf %6, %8 : vector<256x128xf32>
    %c0_7 = arith.constant 0 : index
    %c0_8 = arith.constant 0 : index
    %10 = vector.load %arg5[%c0_7, %c0_8] : memref<256x128xf32, #tpu.memory_space<vmem>>, vector<256x128xf32>
    tpu.vector_store %arg5[%c0_7, %c0_8], %9 {strides = array<i32>} : memref<256x128xf32, #tpu.memory_space<vmem>>, vector<256x128xf32>,
    return
  }
  func.func @transform_0(%arg0: i32) -> (i32, i32) {
    %c0_i32 = arith.constant 0 : i32
    %c0_i32_0 = arith.constant 0 : i32
    return %arg0, %c0_i32 : i32, i32
  }
  func.func @transform_1(%arg0: i32) -> (i32, i32) {
    %c0_i32 = arith.constant 0 : i32
    %c0_i32_0 = arith.constant 0 : i32
    %c0_i32_1 = arith.constant 0 : i32
    return %c0_i32, %c0_i32_0 : i32, i32
  }
  func.func @transform_2(%arg0: i32) -> (i32, i32) {
    %c0_i32 = arith.constant 0 : i32
    %c0_i32_0 = arith.constant 0 : i32
    %c0_i32_1 = arith.constant 0 : i32
    return %c0_i32, %c0_i32_0 : i32, i32
  }
  func.func @transform_3(%arg0: i32) -> (i32, i32) {
    %c0_i32 = arith.constant 0 : i32
    %c0_i32_0 = arith.constant 0 : i32
    return %arg0, %c0_i32 : i32, i32
  }
  func.func @transform_4(%arg0: i32) -> (i32, i32) {
    %c0_i32 = arith.constant 0 : i32
    %c0_i32_0 = arith.constant 0 : i32
    return %arg0, %c0_i32 : i32, i32
  }
}

</mosaic_0001>

<bundles_post_ra>
// kernel: tpu_custom_call.1
= control target key start
LH: loop header
LB: loop body
LE: loop exit
PB: predicated region body
PF: predicated region fallthrough
CT: control target
= control target key end

     0   :  { %10 = vsyncpa [#allocation3], 0  ;;  %s1844_s0 = inlined_call_operand.hbm [shape: f32[512,128], index: 0, kind: input, shape index: {}]   ;;  %s1845_s1 = inlined_call_operand.hbm [shape: f32[128,256], index: 1, kind: input, shape index: {}]   ;;  %s1846_s2 = inlined_call_operand.vmem [shape: f32[1,128], index: 2, kind: input, shape index: {}]   ;;  %s1847_s3 = inlined_call_operand.hbm [shape: bf16[512,128], index: 3, kind: output, shape index: {0}]   ;;  %s1848_s4 = inlined_call_operand.hbm [shape: f32[512,128], index: 4, kind: output, shape index: {1}]  }
   0x1   :  { %12 = vsyncpa [#allocation3 + $0x1], 0 }
   0x2   :  { %13 = vsyncpa [#allocation6], 0 }
   0x3   :  { %14 = vsyncpa [#allocation4], 0 }
   0x4   :  { %16 = vsyncpa [#allocation4 + $0x1], 0 }
   0x5   :  { %17 = vsyncpa [#allocation9], 0 }
   0x6   :  { %19 = vsyncpa [#allocation9 + $0x1], 0  ;;  %s1449_s15 = smov 0   ;;  %s1451_s16 = smov 0  }
   0x7   :  { %s1453_s17 = smov 0   ;;  %s1455_s18 = smov 0  }
   0x8 LB: > { %s1470_s19 = sadd.s32 4294967295, %s1409_s18   ;;  %s947_s20 = sadd.s32 4294967294, %s1409_s18   ;;  %s1409_s18 = sphi %s1455_s18, %s1868_s18   ;;  %s1405_s17 = sphi %s1453_s17, %s1867_s17   ;;  %s1401_s16 = sphi %s1451_s16, %s1866_s16   ;;  %s1397_s15 = sphi %s1449_s15, %s1865_s15  }
   0x9   : > { %p45_p0 = scmp.ne.s32.totalorder %s1401_s16, %s1397_s15  ;;  %p1849_p1 = scmp.eq.s32.totalorder %s1470_s19, 0 }
   0xa   : > { %p117_p3 = scmp.eq.s32.totalorder %s947_s20, 1  ;;  %p948_p5 = scmp.ge.s32.totalorder %s1409_s18, 1 }
   0xb   : > { %p1479_p4 = por %p1849_p1, %p45_p0  ;;  %p150_p7 = scmp.lt.s32.totalorder %s1409_s18, 3 }
   0xc   : > { %p1484_p6 = por %p117_p3, %p45_p0  ;;  %s1411_s24 = smov [#allocation5]  }
   0xd   : > { %s1852_s21 = scalar_select %p1479_p4, 1, 0 }
   0xe   : > { %s1853_s22 = scalar_select %p1484_p6, 1, 0 }
   0xf   : > { %p1489_p8 = pnand %p948_p5, %p150_p7  ;;  %s162_s25 = sshll.u32 %s1411_s24, 4  ;;  %s1493_s25 = int_to_ptr.vmem [resolvable:$true] %s162_s25 }
  0x10   : > { %s1505_s27 = sadd.s32 1, %s1409_s18   ;;  %s32_s28 = sadd.s32 1, %s1405_s17 }
  0x11   : > { %s1854_s23 = scalar_select %p1489_p8, 1, 0 }
  0x12   : > { %p1188_p9 = pneg %p1489_p8  ;;  %s29_s29 = ssub.s32 %s1409_s18, %s1505_s27 }
  0x13   : > { %s1249_s6 = scalar_lea.hbm %s1845_s1, 4096 }
  0x14   : > { %p1500_p11 = pnand %p1188_p9, %p1849_p1  ;;  %p1250_p12 = scmp.ne.s32.totalorder %s1845_s1, %s1249_s6 }
  0x15   : > { %p1256_p5 = scmp.lt.u32.totalorder %s1249_s6, %s1845_s1 }
  0x16   : > { %p1251_p13 = pneg %p1500_p11 }
  0x18   : > { %p1252_p0 = pnand %p1251_p13, %p1250_p12 }
  0x1a   : > { %p1253_p3 = pneg %p1252_p0 }
  0x1c   : > { %p1258_p7 = pnand %p1256_p5, %p1253_p3 }
  0x1e   : > { %1261 = shalt.err (!%p1258_p7)
}
  0x1f   : > { %s1262_s11 = scalar_lea.vmem %s1493_s25, 4096  ;;  %p1270_p2 = scmp.lt.s32.totalorder %s1493_s25, %s1493_s25 }
  0x20   : > { %p1263_p9 = scmp.ne.s32.totalorder %s1493_s25, %s1262_s11  ;;  %p1271_p6 = scmp.lt.s32.totalorder %s1262_s11, %s1262_s11 }
  0x22   : > { %p1265_p10 = pnand %p1263_p9, %p1251_p13  ;;  %p1272_p4 = por %p1271_p6, %p1270_p2 }
  0x24   : > { %p1266_p1 = pneg %p1265_p10 }
  0x26   : > { %p1273_p8 = pnand %p1272_p4, %p1266_p1 }
  0x28   : > { %1276 = shalt.err (!%p1273_p8)
}
  0x29   : > { %s1412_s12 = smov 256   ;;  %s1413_s13 = smov 16  }
  0x2a   : > { %1191 = dma.hbm_to_vmem [thread:$0]  (!%p1500_p11), %s1845_s1, 4096, %s1493_s25, [#allocation6], %s1412_s12, %s1412_s12, %s1413_s13  }
  0x2b   : > { %p30_p2 = scmp.eq.s32.totalorder %s29_s29, 0  ;;  %p39_p1 = scmp.ne.s32.totalorder %s1405_s17, %s1401_s16 }
  0x2c   : > { %p40_p4 = scmp.eq.s32.totalorder %s1409_s18, 0  ;;  %p1204_p6 = scmp.lt.s32.totalorder %s1409_s18, 2 }
  0x2d   : > { %s1536_s24 = scalar_select %p30_p2, %s1405_s17, %s32_s28  }
  0x2e   : > { %p41_p8 = por %p40_p4, %p39_p1  ;;  %p1856_p10 = scmp.eq.s32.totalorder %s1470_s19, 1 }
  0x2f   : > { %s179_s5 = sand.u32 1, %s1405_s17   ;;  %s1000_s6 = sshll.u32 %s1409_s18, 12 }
  0x30   : > { %p1540_p12 = por %p1856_p10, %p39_p1  ;;  %s951_s7 = sshll.u32 %s179_s5, 8 }
  0x31   : > { %s1549_s9 = scalar_lea.hbm %s1844_s0, %s1000_s6  ;;  %s183_s25 = scalar_lea.vmem [#allocation2], %s951_s7 }
  0x32   : > { %s190_s28 = sshll.u32 %s183_s25, 4  ;;  %p1551_p11 = pnand %p1204_p6, %p41_p8  ;;  %s1555_s28 = int_to_ptr.vmem [resolvable:$true] %s190_s28 }
  0x33   : > { %s1557_s10 = scalar_lea.sflag [#allocation3], %s179_s5  ;;  %s1277_s11 = scalar_lea.hbm %s1549_s9, 4096 }
  0x34   : > { %p1278_p13 = scmp.ne.s32.totalorder %s1549_s9, %s1277_s11  ;;  %p1279_p0 = pneg %p1551_p11 }
  0x35   : > { %s1282_s14 = scalar_lea.hbm %s1844_s0, 8192  ;;  %p1283_p7 = scmp.lt.u32.totalorder %s1549_s9, %s1844_s0 }
  0x36   : > { %p1280_p3 = pnand %p1279_p0, %p1278_p13  ;;  %p1284_p9 = scmp.lt.u32.totalorder %s1282_s14, %s1277_s11 }
  0x37   : > { %p1286_p1 = scmp.lt.u32.totalorder %s1277_s11, %s1549_s9 }
  0x38   : > { %p1281_p5 = pneg %p1280_p3  ;;  %p1285_p2 = por %p1284_p9, %p1283_p7 }
  0x3a   : > { %p1287_p4 = por %p1286_p1, %p1285_p2 }
  0x3c   : > { %p1288_p6 = pnand %p1287_p4, %p1281_p5 }
  0x3e   : > { %1291 = shalt.err (!%p1288_p6)
}
  0x3f   : > { %s1292_s5 = scalar_lea.vmem %s1555_s28, 4096  ;;  %s1414_s7 = smov [#allocation2]  }
  0x40   : > { %p1293_p8 = scmp.ne.s32.totalorder %s1555_s28, %s1292_s5  ;;  %s1297_s26 = sshll.u32 %s1414_s7, 4  ;;  %s1298_s26 = int_to_ptr.vmem [resolvable:$false] %s1297_s26 }
  0x41   : > { %s1299_s8 = scalar_lea.vmem %s1298_s26, 8192  ;;  %p1300_p3 = scmp.lt.s32.totalorder %s1555_s28, %s1298_s26 }
  0x42   : > { %p1295_p10 = pnand %p1293_p8, %p1279_p0  ;;  %p1301_p7 = scmp.lt.s32.totalorder %s1299_s8, %s1292_s5 }
  0x44   : > { %p1296_p13 = pneg %p1295_p10  ;;  %p1302_p9 = por %p1301_p7, %p1300_p3 }
  0x46   : > { %p1303_p2 = pnand %p1302_p9, %p1296_p13 }
  0x48   : > { %1306 = shalt.err (!%p1303_p2)
}
  0x49   : > { %s1415_s25 = smov 128   ;;  %s1416_s11 = smov 8  }
  0x4a   : > { %1195 = dma.hbm_to_vmem [thread:$0]  (!%p1551_p11), %s1549_s9, 4096, %s1555_s28, %s1557_s10, %s1415_s25, %s1415_s25, %s1416_s11  }
  0x4b   : > { %p1859_p0 = scmp.ne.s32.totalorder %s1854_s23, 0 }
  0x4c   : > { %s1588_s12 = sand.u32 (!%p1859_p0), 1, %s1401_s16   ;;  %p1860_p5 = scmp.ne.s32.totalorder (!%p1859_p0), %s1852_s21, 0 }
  0x4d   : > { %202 = sbr.rel (%p1859_p0) target bundleno = 437 (0x1b5), region = 32  ;;  %s955_s13 = sshll.u32 (!%p1859_p0), %s1588_s12, 8 }
  0x4e   : > { %s205_s14 = scalar_lea.sflag (!%p1859_p0), [#allocation3], %s1588_s12  ;;  %s1594_s20 = scalar_lea.vmem (!%p1859_p0), [#allocation2], %s955_s13 }
  0x54   : > { %1380 = dma.done.wait (%p1860_p5), %s205_s14, 4096  }
  0x55   : > { %1382 = vsyncadd (%p1860_p5), %s205_s14, 4294963200  ;;  %p1861_p11 = scmp.eq.s32.totalorder %s1470_s19, 0 }
  0x57   : > { %1384 = dma.done.wait (%p1861_p11), [#allocation6], 4096   ;;  %p1862_p1 = pmov %p1861_p11 }
  0x58   : > { %v1417_v0 = vmov 0.0   ;;  %v278_v1 = vld [vmem:[#allocation5 + $0x8] sm:$0xff]  ;;  %v280_v2 = vld [vmem:[#allocation5 + $0x18] sm:$0xff]  ;;  %v277_v3 = vld [vmem:[#allocation5] sm:$0xff]  ;;  %s957_s9 = sshll.u32 %s1588_s12, 7  ;;  %s1678_s28 = scalar_lea.vmem [#allocation8], %s955_s13 }
  0x59   : > { %1386 = vsyncadd (%p1862_p1), [#allocation6], 4294963200  ;;  %373 = vmatprep.mubr.f32.mxu0 %v1417_v0  ;;  %469 = vmatprep.mubr.f32.mxu1 %v1417_v0  ;;  %v1130_v4 = vpack.c.bf16 %v280_v2, %v278_v1  ;;  %v279_v5 = vld [vmem:[#allocation5 + $0x10] sm:$0xff]  ;;  %v282_v6 = vld [vmem:[#allocation5 + $0x28] sm:$0xff]  ;;  %s1684_s29 = scalar_lea.vmem [#allocation7], %s957_s9  ;;  %s1033_s10 = sshll.u32 %s1470_s19, 11 }
  0x5a   : > { %v284_v7 = vld [vmem:[#allocation5 + $0x38] sm:$0xff]  ;;  %v1132_v8 = vpack.c.bf16 %v279_v5, %v277_v3  ;;  %v281_v10 = vld [vmem:[#allocation5 + $0x20] sm:$0xff]  ;;  %v283_v11 = vld [vmem:[#allocation5 + $0x30] sm:$0xff]  ;;  %s816_s6 = sshll.u32 %s1684_s29, 4  ;;  %s1755_s26 = scalar_lea.hbm %s1847_s3, %s1033_s10  ;;  %s1761_s6 = int_to_ptr.vmem [resolvable:$true] %s816_s6 }
  0x5b   : > { %v1134_v9 = vpack.c.bf16 %v284_v7, %v282_v6  ;;  %v286_v12 = vld [vmem:[#allocation5 + $0x48] sm:$0xff]  ;;  %1131 = vmatprep.subr.bf16.mxu0 %v1130_v4  ;;  %1162 = vmatprep.subr.bf16.mxu1 %v1130_v4  ;;  %v288_v13 = vld [vmem:[#allocation5 + $0x58] sm:$0xff]  ;;  %v1136_v14 = vpack.c.bf16 %v283_v11, %v281_v10  ;;  %v285_v16 = vld [vmem:[#allocation5 + $0x40] sm:$0xff]  ;;  %s1034_s8 = sshll.u32 %s1470_s19, 12  ;;  %s832_s25 = sshll.u32 %s1678_s28, 4  ;;  %s1770_s25 = int_to_ptr.vmem [resolvable:$true] %s832_s25 }
  0x5c   : > { %1133 = vmatpush1.bf16.msra.mxu0 %v1132_v8  ;;  %1170 = vmatpush1.bf16.msra.mxu1 %v1132_v8  ;;  %v1138_v15 = vpack.c.bf16 %v288_v13, %v286_v12  ;;  %v287_v17 = vld [vmem:[#allocation5 + $0x50] sm:$0xff]  ;;  %v290_v18 = vld [vmem:[#allocation5 + $0x68] sm:$0xff]  ;;  %v292_v19 = vld [vmem:[#allocation5 + $0x78] sm:$0xff]  ;;  %s1768_s13 = scalar_lea.hbm %s1848_s4, %s1034_s8  ;;  %s798_s14 = scalar_lea.sflag [#allocation4], %s1588_s12 }
  0x5d   : > { %1135 = vmatprep.subr.bf16.mxu0 %v1134_v9  ;;  %1163 = vmatprep.subr.bf16.mxu1 %v1134_v9  ;;  %v1140_v20 = vpack.c.bf16 %v287_v17, %v285_v16  ;;  %v1142_v21 = vpack.c.bf16 %v292_v19, %v290_v18  ;;  %v289_v22 = vld [vmem:[#allocation5 + $0x60] sm:$0xff]  ;;  %v291_v23 = vld [vmem:[#allocation5 + $0x70] sm:$0xff]  ;;  %v294_v24 = vld [vmem:[#allocation5 + $0x88] sm:$0xff]  ;;  %s1418_s21 = smov [#allocation7]  }
  0x5e   : > { %v296_v25 = vld [vmem:[#allocation5 + $0x98] sm:$0xff]  ;;  %v1144_v26 = vpack.c.bf16 %v291_v23, %v289_v22  ;;  %v293_v28 = vld [vmem:[#allocation5 + $0x80] sm:$0xff]  ;;  %v295_v29 = vld [vmem:[#allocation5 + $0x90] sm:$0xff]  ;;  %s1311_s23 = sshll.u32 %s1418_s21, 4  ;;  %s1312_s23 = int_to_ptr.vmem [resolvable:$false] %s1311_s23 }
  0x5f   : > { %v1146_v27 = vpack.c.bf16 %v296_v25, %v294_v24  ;;  %v298_v30 = vld [vmem:[#allocation5 + $0xa8] sm:$0xff]  ;;  %v300_v31 = vld [vmem:[#allocation5 + $0xb8] sm:$0xff]  ;;  %v1148_v32 = vpack.c.bf16 %v295_v29, %v293_v28  ;;  %v297_v34 = vld [vmem:[#allocation5 + $0xa0] sm:$0xff]  ;;  %s1313_s9 = scalar_lea.vmem %s1312_s23, 4096  ;;  %p1314_p10 = scmp.lt.s32.totalorder %s1761_s6, %s1312_s23 }
  0x60   : > { %1137 = vmatpush1.bf16.msra.mxu0 %v1136_v14  ;;  %1171 = vmatpush1.bf16.msra.mxu1 %v1136_v14  ;;  %v1150_v33 = vpack.c.bf16 %v300_v31, %v298_v30  ;;  %v299_v35 = vld [vmem:[#allocation5 + $0xb0] sm:$0xff]  ;;  %v302_v36 = vld [vmem:[#allocation5 + $0xc8] sm:$0xff]  ;;  %v304_v37 = vld [vmem:[#allocation5 + $0xd8] sm:$0xff] }
  0x61   : > { %1139 = vmatprep.subr.bf16.mxu0 %v1138_v15  ;;  %1164 = vmatprep.subr.bf16.mxu1 %v1138_v15  ;;  %v1152_v38 = vpack.c.bf16 %v299_v35, %v297_v34  ;;  %v1154_v39 = vpack.c.bf16 %v304_v37, %v302_v36  ;;  %v301_v40 = vld [vmem:[#allocation5 + $0xc0] sm:$0xff]  ;;  %v303_v41 = vld [vmem:[#allocation5 + $0xd0] sm:$0xff]  ;;  %v306_v42 = vld [vmem:[#allocation5 + $0xe8] sm:$0xff] }
  0x62   : > { %v308_v43 = vld [vmem:[#allocation5 + $0xf8] sm:$0xff]  ;;  %v1156_v44 = vpack.c.bf16 %v303_v41, %v301_v40  ;;  %v305_v46 = vld [vmem:[#allocation5 + $0xe0] sm:$0xff]  ;;  %v307_v47 = vld [vmem:[#allocation5 + $0xf0] sm:$0xff] }
  0x63   : > { %v1158_v45 = vpack.c.bf16 %v308_v43, %v306_v42  ;;  %v1160_v48 = vpack.c.bf16 %v307_v47, %v305_v46  ;;  %v245_v49 = vld [vmem:[%s1594_s20] sm:$0xff]  ;;  %v246_v51 = vld [vmem:[%s1594_s20 + $0x8] sm:$0xff]  ;;  %v247_v53 = vld [vmem:[%s1594_s20 + $0x10] sm:$0xff] }
  0x64   : > { %1141 = vmatpush1.bf16.msra.mxu0 %v1140_v20  ;;  %1172 = vmatpush1.bf16.msra.mxu1 %v1140_v20  ;;  %v261_v50 = vld [vmem:[%s1594_s20 + $0x80] sm:$0xff]  ;;  %v262_v52 = vld [vmem:[%s1594_s20 + $0x88] sm:$0xff]  ;;  %v263_v54 = vld [vmem:[%s1594_s20 + $0x90] sm:$0xff] }
  0x65   : > { %1143 = vmatprep.subr.bf16.mxu0 %v1142_v21  ;;  %1165 = vmatprep.subr.bf16.mxu1 %v1142_v21  ;;  %v248_v55 = vld [vmem:[%s1594_s20 + $0x18] sm:$0xff]  ;;  %v249_v57 = vld [vmem:[%s1594_s20 + $0x20] sm:$0xff]  ;;  %v250_v59 = vld [vmem:[%s1594_s20 + $0x28] sm:$0xff] }
  0x66   : > { %v264_v56 = vld [vmem:[%s1594_s20 + $0x98] sm:$0xff]  ;;  %v265_v58 = vld [vmem:[%s1594_s20 + $0xa0] sm:$0xff]  ;;  %v266_v60 = vld [vmem:[%s1594_s20 + $0xa8] sm:$0xff] }
  0x67   : > { %v251_v61 = vld [vmem:[%s1594_s20 + $0x30] sm:$0xff]  ;;  %v252_v63 = vld [vmem:[%s1594_s20 + $0x38] sm:$0xff]  ;;  %v253_v2 = vld [vmem:[%s1594_s20 + $0x40] sm:$0xff] }
  0x68   : > { %1145 = vmatpush1.bf16.msra.mxu0 %v1144_v26  ;;  %1173 = vmatpush1.bf16.msra.mxu1 %v1144_v26  ;;  %v267_v62 = vld [vmem:[%s1594_s20 + $0xb0] sm:$0xff]  ;;  %v268_v1 = vld [vmem:[%s1594_s20 + $0xb8] sm:$0xff]  ;;  %v269_v3 = vld [vmem:[%s1594_s20 + $0xc0] sm:$0xff] }
  0x69   : > { %1147 = vmatprep.subr.bf16.mxu0 %v1146_v27  ;;  %1166 = vmatprep.subr.bf16.mxu1 %v1146_v27  ;;  %v254_v4 = vld [vmem:[%s1594_s20 + $0x48] sm:$0xff]  ;;  %v255_v6 = vld [vmem:[%s1594_s20 + $0x50] sm:$0xff]  ;;  %v256_v8 = vld [vmem:[%s1594_s20 + $0x58] sm:$0xff] }
  0x6a   : > { %v270_v5 = vld [vmem:[%s1594_s20 + $0xc8] sm:$0xff]  ;;  %v271_v7 = vld [vmem:[%s1594_s20 + $0xd0] sm:$0xff]  ;;  %v272_v9 = vld [vmem:[%s1594_s20 + $0xd8] sm:$0xff] }
  0x6b   : > { %v257_v10 = vld [vmem:[%s1594_s20 + $0x60] sm:$0xff]  ;;  %v258_v12 = vld [vmem:[%s1594_s20 + $0x68] sm:$0xff]  ;;  %v259_v14 = vld [vmem:[%s1594_s20 + $0x70] sm:$0xff] }
  0x6c   : > { %1149 = vmatpush1.bf16.msra.mxu0 %v1148_v32  ;;  %1174 = vmatpush1.bf16.msra.mxu1 %v1148_v32  ;;  %v273_v11 = vld [vmem:[%s1594_s20 + $0xe0] sm:$0xff]  ;;  %v274_v13 = vld [vmem:[%s1594_s20 + $0xe8] sm:$0xff]  ;;  %v275_v15 = vld [vmem:[%s1594_s20 + $0xf0] sm:$0xff] }
  0x6d   : > { %1151 = vmatprep.subr.bf16.mxu0 %v1150_v33  ;;  %1167 = vmatprep.subr.bf16.mxu1 %v1150_v33  ;;  %v260_v16 = vld [vmem:[%s1594_s20 + $0x78] sm:$0xff]  ;;  %v1671_v18 = vld [vmem:[%s1846_s2] ss:$0 sm:$0xff] }
  0x6e   : > { %v276_v17 = vld [vmem:[%s1594_s20 + $0xf8] sm:$0xff]  ;;  %s1307_s20 = scalar_lea.vmem %s1761_s6, 2048 }
  0x6f   : > { %p1308_p4 = scmp.ne.s32.totalorder %s1761_s6, %s1307_s20  ;;  %p1315_p13 = scmp.lt.s32.totalorder %s1313_s9, %s1307_s20 }
  0x70   : > { %1153 = vmatpush1.bf16.msra.mxu0 %v1152_v38  ;;  %1175 = vmatpush1.bf16.msra.mxu1 %v1152_v38 }
  0x71   : > { %1155 = vmatprep.subr.bf16.mxu0 %v1154_v39  ;;  %1168 = vmatprep.subr.bf16.mxu1 %v1154_v39  ;;  %p1309_p6 = pnand %p1308_p4, %p1540_p12  ;;  %p1316_p3 = por %p1315_p13, %p1314_p10 }
  0x73   : > { %p1310_p8 = pneg %p1309_p6 }
  0x74   : > { %1157 = vmatpush1.bf16.msra.mxu0 %v1156_v44  ;;  %1176 = vmatpush1.bf16.msra.mxu1 %v1156_v44 }
  0x75   : > { %1159 = vmatprep.subr.bf16.mxu0 %v1158_v45  ;;  %1169 = vmatprep.subr.bf16.mxu1 %v1158_v45  ;;  %p1317_p7 = pnand %p1316_p3, %p1310_p8 }
  0x78   : > { %1161 = vmatpush1.bf16.msra.mxu0 %v1160_v48  ;;  %1177 = vmatpush1.bf16.msra.mxu1 %v1160_v48 }
  0x7b   : > { %374 = vmatmul.mubr.f32.vlgmr.msra.gmra.mrb[0].mxu0 %v245_v49  ;;  %470 = vmatmul.mubr.f32.vlgmr.msra.gmra.mrb[0].mxu1 %v261_v50 }
  0x7c   : > { %379 = vmatprep.mubr.f32.mxu0 %v1417_v0  ;;  %475 = vmatprep.mubr.f32.mxu1 %v1417_v0 }
  0x7f   : > { %380 = vmatmul.mubr.f32.gmra.mrb[2].mxu0 %v246_v51  ;;  %476 = vmatmul.mubr.f32.gmra.mrb[2].mxu1 %v262_v52 }
  0x80   : > { %385 = vmatprep.mubr.f32.mxu0 %v1417_v0  ;;  %481 = vmatprep.mubr.f32.mxu1 %v1417_v0 }
  0x83   : > { %386 = vmatmul.mubr.f32.gmra.mrb[4].mxu0 %v247_v53  ;;  %482 = vmatmul.mubr.f32.gmra.mrb[4].mxu1 %v263_v54 }
  0x84   : > { %391 = vmatprep.mubr.f32.mxu0 %v1417_v0  ;;  %487 = vmatprep.mubr.f32.mxu1 %v1417_v0 }
  0x87   : > { %392 = vmatmul.mubr.f32.gmra.mrb[6].mxu0 %v248_v55  ;;  %488 = vmatmul.mubr.f32.gmra.mrb[6].mxu1 %v264_v56 }
  0x88   : > { %397 = vmatprep.mubr.f32.mxu0 %v1417_v0  ;;  %493 = vmatprep.mubr.f32.mxu1 %v1417_v0 }
  0x8b   : > { %398 = vmatmul.mubr.f32.gmra.mrb[8].mxu0 %v249_v57  ;;  %494 = vmatmul.mubr.f32.gmra.mrb[8].mxu1 %v265_v58 }
  0x8c   : > { %403 = vmatprep.mubr.f32.mxu0 %v1417_v0  ;;  %499 = vmatprep.mubr.f32.mxu1 %v1417_v0 }
  0x8f   : > { %404 = vmatmul.mubr.f32.gmra.mrb[10].mxu0 %v250_v59  ;;  %500 = vmatmul.mubr.f32.gmra.mrb[10].mxu1 %v266_v60 }
  0x90   : > { %409 = vmatprep.mubr.f32.mxu0 %v1417_v0  ;;  %505 = vmatprep.mubr.f32.mxu1 %v1417_v0 }
  0x93   : > { %410 = vmatmul.mubr.f32.gmra.mrb[12].mxu0 %v251_v61  ;;  %506 = vmatmul.mubr.f32.gmra.mrb[12].mxu1 %v267_v62 }
  0x94   : > { %415 = vmatprep.mubr.f32.mxu0 %v1417_v0  ;;  %511 = vmatprep.mubr.f32.mxu1 %v1417_v0 }
  0x97   : > { %416 = vmatmul.mubr.f32.gmra.mrb[14].mxu0 %v252_v63  ;;  %512 = vmatmul.mubr.f32.gmra.mrb[14].mxu1 %v268_v1 }
  0x98   : > { %421 = vmatprep.mubr.f32.mxu0 %v1417_v0  ;;  %517 = vmatprep.mubr.f32.mxu1 %v1417_v0 }
  0x9b   : > { %422 = vmatmul.mubr.f32.gmra.mrb[16].mxu0 %v253_v2  ;;  %518 = vmatmul.mubr.f32.gmra.mrb[16].mxu1 %v269_v3 }
  0x9c   : > { %427 = vmatprep.mubr.f32.mxu0 %v1417_v0  ;;  %523 = vmatprep.mubr.f32.mxu1 %v1417_v0 }
  0x9f   : > { %428 = vmatmul.mubr.f32.gmra.mrb[18].mxu0 %v254_v4  ;;  %524 = vmatmul.mubr.f32.gmra.mrb[18].mxu1 %v270_v5 }
  0xa0   : > { %433 = vmatprep.mubr.f32.mxu0 %v1417_v0  ;;  %529 = vmatprep.mubr.f32.mxu1 %v1417_v0 }
  0xa3   : > { %434 = vmatmul.mubr.f32.gmra.mrb[20].mxu0 %v255_v6  ;;  %530 = vmatmul.mubr.f32.gmra.mrb[20].mxu1 %v271_v7 }
  0xa4   : > { %439 = vmatprep.mubr.f32.mxu0 %v1417_v0  ;;  %535 = vmatprep.mubr.f32.mxu1 %v1417_v0 }
  0xa7   : > { %440 = vmatmul.mubr.f32.gmra.mrb[22].mxu0 %v256_v8  ;;  %536 = vmatmul.mubr.f32.gmra.mrb[22].mxu1 %v272_v9 }
  0xa8   : > { %445 = vmatprep.mubr.f32.mxu0 %v1417_v0  ;;  %541 = vmatprep.mubr.f32.mxu1 %v1417_v0 }
  0xab   : > { %446 = vmatmul.mubr.f32.gmra.mrb[24].mxu0 %v257_v10  ;;  %542 = vmatmul.mubr.f32.gmra.mrb[24].mxu1 %v273_v11 }
  0xac   : > { %451 = vmatprep.mubr.f32.mxu0 %v1417_v0  ;;  %547 = vmatprep.mubr.f32.mxu1 %v1417_v0 }
  0xaf   : > { %452 = vmatmul.mubr.f32.gmra.mrb[26].mxu0 %v258_v12  ;;  %548 = vmatmul.mubr.f32.gmra.mrb[26].mxu1 %v274_v13 }
  0xb0   : > { %457 = vmatprep.mubr.f32.mxu0 %v1417_v0  ;;  %553 = vmatprep.mubr.f32.mxu1 %v1417_v0 }
  0xb3   : > { %458 = vmatmul.mubr.f32.gmra.mrb[28].mxu0 %v259_v14  ;;  %554 = vmatmul.mubr.f32.gmra.mrb[28].mxu1 %v275_v15 }
  0xb4   : > { %463 = vmatprep.mubr.f32.mxu0 %v1417_v0  ;;  %559 = vmatprep.mubr.f32.mxu1 %v1417_v0 }
  0xb7   : > { %464 = vmatmul.mubr.f32.gmra.mrb[30].mxu0 %v260_v16  ;;  %560 = vmatmul.mubr.f32.gmra.mrb[30].mxu1 %v276_v17 }
 0x14e   : > { %v375_v19 = vpop.f32.mrb[0].mxu0  ;;  %v471_v20 = vpop.f32.mrb[0].mxu1 }
 0x14f   : > { %v377_v21 = vpop.f32.mrb[1].mxu0  ;;  %v473_v22 = vpop.f32.mrb[1].mxu1 }
 0x150   : > { %v733_v23 = vadd.f32 %v1671_v18, %v377_v21  ;;  %v749_v24 = vadd.f32 %v1671_v18, %v473_v22 }
 0x152   : > { %765 = vst [vmem:[%s1678_s28] sm:$0xff] %v733_v23  ;;  %781 = vst [vmem:[%s1678_s28 + $0x80] sm:$0xff] %v749_v24  ;;  %v381_v0 = vpop.f32.mrb[2].mxu0  ;;  %v477_v25 = vpop.f32.mrb[2].mxu1 }
 0x153   : > { %v1038_v26 = vpack.c.bf16 %v381_v0, %v375_v19  ;;  %v1078_v27 = vpack.c.bf16 %v477_v25, %v471_v20  ;;  %v383_v28 = vpop.f32.mrb[3].mxu0  ;;  %v479_v29 = vpop.f32.mrb[3].mxu1 }
 0x154   : > { %v734_v30 = vadd.f32 %v1671_v18, %v383_v28  ;;  %v750_v31 = vadd.f32 %v1671_v18, %v479_v29 }
 0x155   : > { %1039 = vst [vmem:[%s1684_s29] sm:$0xff] %v1038_v26   ;;  %1122 = vst [vmem:[%s1684_s29 + $0x40] sm:$0xff] %v1078_v27  }
 0x156   : > { %766 = vst [vmem:[%s1678_s28 + $0x8] sm:$0xff] %v734_v30  ;;  %782 = vst [vmem:[%s1678_s28 + $0x88] sm:$0xff] %v750_v31  ;;  %v387_v32 = vpop.f32.mrb[4].mxu0  ;;  %v483_v33 = vpop.f32.mrb[4].mxu1 }
 0x157   : > { %v389_v34 = vpop.f32.mrb[5].mxu0  ;;  %v485_v35 = vpop.f32.mrb[5].mxu1 }
 0x158   : > { %v735_v36 = vadd.f32 %v1671_v18, %v389_v34  ;;  %v751_v37 = vadd.f32 %v1671_v18, %v485_v35 }
 0x15a   : > { %767 = vst [vmem:[%s1678_s28 + $0x10] sm:$0xff] %v735_v36  ;;  %783 = vst [vmem:[%s1678_s28 + $0x90] sm:$0xff] %v751_v37  ;;  %v393_v38 = vpop.f32.mrb[6].mxu0  ;;  %v489_v39 = vpop.f32.mrb[6].mxu1 }
 0x15b   : > { %v1043_v40 = vpack.c.bf16 %v393_v38, %v387_v32  ;;  %v1083_v41 = vpack.c.bf16 %v489_v39, %v483_v33  ;;  %v395_v42 = vpop.f32.mrb[7].mxu0  ;;  %v491_v43 = vpop.f32.mrb[7].mxu1 }
 0x15c   : > { %v736_v44 = vadd.f32 %v1671_v18, %v395_v42  ;;  %v752_v45 = vadd.f32 %v1671_v18, %v491_v43 }
 0x15d   : > { %1115 = vst [vmem:[%s1684_s29 + $0x8] sm:$0xff] %v1043_v40   ;;  %1123 = vst [vmem:[%s1684_s29 + $0x48] sm:$0xff] %v1083_v41  }
 0x15e   : > { %768 = vst [vmem:[%s1678_s28 + $0x18] sm:$0xff] %v736_v44  ;;  %784 = vst [vmem:[%s1678_s28 + $0x98] sm:$0xff] %v752_v45  ;;  %v399_v46 = vpop.f32.mrb[8].mxu0  ;;  %v495_v47 = vpop.f32.mrb[8].mxu1 }
 0x15f   : > { %v401_v48 = vpop.f32.mrb[9].mxu0  ;;  %v497_v49 = vpop.f32.mrb[9].mxu1 }
 0x160   : > { %v737_v50 = vadd.f32 %v1671_v18, %v401_v48  ;;  %v753_v51 = vadd.f32 %v1671_v18, %v497_v49 }
 0x162   : > { %769 = vst [vmem:[%s1678_s28 + $0x20] sm:$0xff] %v737_v50  ;;  %785 = vst [vmem:[%s1678_s28 + $0xa0] sm:$0xff] %v753_v51  ;;  %v405_v52 = vpop.f32.mrb[10].mxu0  ;;  %v501_v53 = vpop.f32.mrb[10].mxu1 }
 0x163   : > { %v1048_v54 = vpack.c.bf16 %v405_v52, %v399_v46  ;;  %v1088_v55 = vpack.c.bf16 %v501_v53, %v495_v47  ;;  %v407_v56 = vpop.f32.mrb[11].mxu0  ;;  %v503_v57 = vpop.f32.mrb[11].mxu1 }
 0x164   : > { %v738_v58 = vadd.f32 %v1671_v18, %v407_v56  ;;  %v754_v59 = vadd.f32 %v1671_v18, %v503_v57 }
 0x165   : > { %1116 = vst [vmem:[%s1684_s29 + $0x10] sm:$0xff] %v1048_v54   ;;  %1124 = vst [vmem:[%s1684_s29 + $0x50] sm:$0xff] %v1088_v55  }
 0x166   : > { %770 = vst [vmem:[%s1678_s28 + $0x28] sm:$0xff] %v738_v58  ;;  %786 = vst [vmem:[%s1678_s28 + $0xa8] sm:$0xff] %v754_v59  ;;  %v411_v60 = vpop.f32.mrb[12].mxu0  ;;  %v507_v61 = vpop.f32.mrb[12].mxu1 }
 0x167   : > { %v413_v62 = vpop.f32.mrb[13].mxu0  ;;  %v509_v63 = vpop.f32.mrb[13].mxu1 }
 0x168   : > { %v739_v1 = vadd.f32 %v1671_v18, %v413_v62  ;;  %v755_v2 = vadd.f32 %v1671_v18, %v509_v63 }
 0x16a   : > { %771 = vst [vmem:[%s1678_s28 + $0x30] sm:$0xff] %v739_v1  ;;  %787 = vst [vmem:[%s1678_s28 + $0xb0] sm:$0xff] %v755_v2  ;;  %v417_v3 = vpop.f32.mrb[14].mxu0  ;;  %v513_v4 = vpop.f32.mrb[14].mxu1 }
 0x16b   : > { %v1053_v5 = vpack.c.bf16 %v417_v3, %v411_v60  ;;  %v1093_v6 = vpack.c.bf16 %v513_v4, %v507_v61  ;;  %v419_v7 = vpop.f32.mrb[15].mxu0  ;;  %v515_v8 = vpop.f32.mrb[15].mxu1 }
 0x16c   : > { %v740_v9 = vadd.f32 %v1671_v18, %v419_v7  ;;  %v756_v10 = vadd.f32 %v1671_v18, %v515_v8 }
 0x16d   : > { %1117 = vst [vmem:[%s1684_s29 + $0x18] sm:$0xff] %v1053_v5   ;;  %1125 = vst [vmem:[%s1684_s29 + $0x58] sm:$0xff] %v1093_v6  }
 0x16e   : > { %772 = vst [vmem:[%s1678_s28 + $0x38] sm:$0xff] %v740_v9  ;;  %788 = vst [vmem:[%s1678_s28 + $0xb8] sm:$0xff] %v756_v10  ;;  %v423_v11 = vpop.f32.mrb[16].mxu0  ;;  %v519_v12 = vpop.f32.mrb[16].mxu1 }
 0x16f   : > { %v425_v13 = vpop.f32.mrb[17].mxu0  ;;  %v521_v14 = vpop.f32.mrb[17].mxu1 }
 0x170   : > { %v741_v15 = vadd.f32 %v1671_v18, %v425_v13  ;;  %v757_v16 = vadd.f32 %v1671_v18, %v521_v14 }
 0x172   : > { %773 = vst [vmem:[%s1678_s28 + $0x40] sm:$0xff] %v741_v15  ;;  %789 = vst [vmem:[%s1678_s28 + $0xc0] sm:$0xff] %v757_v16  ;;  %v429_v17 = vpop.f32.mrb[18].mxu0  ;;  %v525_v19 = vpop.f32.mrb[18].mxu1 }
 0x173   : > { %v1058_v20 = vpack.c.bf16 %v429_v17, %v423_v11  ;;  %v1098_v21 = vpack.c.bf16 %v525_v19, %v519_v12  ;;  %v431_v22 = vpop.f32.mrb[19].mxu0  ;;  %v527_v23 = vpop.f32.mrb[19].mxu1 }
 0x174   : > { %v742_v24 = vadd.f32 %v1671_v18, %v431_v22  ;;  %v758_v0 = vadd.f32 %v1671_v18, %v527_v23 }
 0x175   : > { %1118 = vst [vmem:[%s1684_s29 + $0x20] sm:$0xff] %v1058_v20   ;;  %1126 = vst [vmem:[%s1684_s29 + $0x60] sm:$0xff] %v1098_v21  }
 0x176   : > { %774 = vst [vmem:[%s1678_s28 + $0x48] sm:$0xff] %v742_v24  ;;  %790 = vst [vmem:[%s1678_s28 + $0xc8] sm:$0xff] %v758_v0  ;;  %v435_v25 = vpop.f32.mrb[20].mxu0  ;;  %v531_v26 = vpop.f32.mrb[20].mxu1 }
 0x177   : > { %v437_v27 = vpop.f32.mrb[21].mxu0  ;;  %v533_v28 = vpop.f32.mrb[21].mxu1 }
 0x178   : > { %v743_v29 = vadd.f32 %v1671_v18, %v437_v27  ;;  %v759_v30 = vadd.f32 %v1671_v18, %v533_v28 }
 0x17a   : > { %775 = vst [vmem:[%s1678_s28 + $0x50] sm:$0xff] %v743_v29  ;;  %791 = vst [vmem:[%s1678_s28 + $0xd0] sm:$0xff] %v759_v30  ;;  %v441_v31 = vpop.f32.mrb[22].mxu0  ;;  %v537_v32 = vpop.f32.mrb[22].mxu1 }
 0x17b   : > { %v1063_v33 = vpack.c.bf16 %v441_v31, %v435_v25  ;;  %v1103_v34 = vpack.c.bf16 %v537_v32, %v531_v26  ;;  %v443_v35 = vpop.f32.mrb[23].mxu0  ;;  %v539_v36 = vpop.f32.mrb[23].mxu1 }
 0x17c   : > { %v744_v37 = vadd.f32 %v1671_v18, %v443_v35  ;;  %v760_v38 = vadd.f32 %v1671_v18, %v539_v36 }
 0x17d   : > { %1119 = vst [vmem:[%s1684_s29 + $0x28] sm:$0xff] %v1063_v33   ;;  %1127 = vst [vmem:[%s1684_s29 + $0x68] sm:$0xff] %v1103_v34  }
 0x17e   : > { %776 = vst [vmem:[%s1678_s28 + $0x58] sm:$0xff] %v744_v37  ;;  %792 = vst [vmem:[%s1678_s28 + $0xd8] sm:$0xff] %v760_v38  ;;  %v447_v39 = vpop.f32.mrb[24].mxu0  ;;  %v543_v40 = vpop.f32.mrb[24].mxu1 }
 0x17f   : > { %v449_v41 = vpop.f32.mrb[25].mxu0  ;;  %v545_v42 = vpop.f32.mrb[25].mxu1 }
 0x180   : > { %v745_v43 = vadd.f32 %v1671_v18, %v449_v41  ;;  %v761_v44 = vadd.f32 %v1671_v18, %v545_v42 }
 0x182   : > { %777 = vst [vmem:[%s1678_s28 + $0x60] sm:$0xff] %v745_v43  ;;  %793 = vst [vmem:[%s1678_s28 + $0xe0] sm:$0xff] %v761_v44  ;;  %v453_v45 = vpop.f32.mrb[26].mxu0  ;;  %v549_v46 = vpop.f32.mrb[26].mxu1 }
 0x183   : > { %v1068_v47 = vpack.c.bf16 %v453_v45, %v447_v39  ;;  %v1108_v48 = vpack.c.bf16 %v549_v46, %v543_v40  ;;  %v455_v49 = vpop.f32.mrb[27].mxu0  ;;  %v551_v50 = vpop.f32.mrb[27].mxu1 }
 0x184   : > { %v746_v51 = vadd.f32 %v1671_v18, %v455_v49  ;;  %v762_v52 = vadd.f32 %v1671_v18, %v551_v50 }
 0x185   : > { %1120 = vst [vmem:[%s1684_s29 + $0x30] sm:$0xff] %v1068_v47   ;;  %1128 = vst [vmem:[%s1684_s29 + $0x70] sm:$0xff] %v1108_v48  }
 0x186   : > { %778 = vst [vmem:[%s1678_s28 + $0x68] sm:$0xff] %v746_v51  ;;  %794 = vst [vmem:[%s1678_s28 + $0xe8] sm:$0xff] %v762_v52  ;;  %v459_v53 = vpop.f32.mrb[28].mxu0  ;;  %v555_v54 = vpop.f32.mrb[28].mxu1 }
 0x187   : > { %v461_v55 = vpop.f32.mrb[29].mxu0  ;;  %v557_v56 = vpop.f32.mrb[29].mxu1 }
 0x188   : > { %v747_v57 = vadd.f32 %v1671_v18, %v461_v55  ;;  %v763_v58 = vadd.f32 %v1671_v18, %v557_v56 }
 0x18a   : > { %779 = vst [vmem:[%s1678_s28 + $0x70] sm:$0xff] %v747_v57  ;;  %795 = vst [vmem:[%s1678_s28 + $0xf0] sm:$0xff] %v763_v58  ;;  %v465_v59 = vpop.f32.mrb[30].mxu0  ;;  %v561_v60 = vpop.f32.mrb[30].mxu1 }
 0x18b   : > { %v1073_v61 = vpack.c.bf16 %v465_v59, %v459_v53  ;;  %v1113_v62 = vpack.c.bf16 %v561_v60, %v555_v54  ;;  %v467_v63 = vpop.f32.mrb[31].mxu0  ;;  %v563_v1 = vpop.f32.mrb[31].mxu1 }
 0x18c   : > { %v748_v2 = vadd.f32 %v1671_v18, %v467_v63  ;;  %v764_v3 = vadd.f32 %v1671_v18, %v563_v1 }
 0x18d   : > { %1121 = vst [vmem:[%s1684_s29 + $0x38] sm:$0xff] %v1073_v61   ;;  %1129 = vst [vmem:[%s1684_s29 + $0x78] sm:$0xff] %v1113_v62  }
 0x18e   : > { %780 = vst [vmem:[%s1678_s28 + $0x78] sm:$0xff] %v748_v2  ;;  %796 = vst [vmem:[%s1678_s28 + $0xf8] sm:$0xff] %v764_v3 }
 0x18f   : > { %1320 = shalt.err (!%p1317_p7)
}
 0x190   : > { %s1321_s28 = scalar_lea.hbm %s1755_s26, 2048  ;;  %s1325_s5 = scalar_lea.hbm %s1847_s3, 4096 }
 0x191   : > { %p1322_p9 = scmp.ne.s32.totalorder %s1755_s26, %s1321_s28  ;;  %p1326_p5 = scmp.lt.u32.totalorder %s1755_s26, %s1847_s3 }
 0x192   : > { %p1327_p11 = scmp.lt.u32.totalorder %s1325_s5, %s1321_s28  ;;  %p1329_p4 = scmp.lt.u32.totalorder %s1321_s28, %s1755_s26 }
 0x193   : > { %p1323_p2 = pnand %p1322_p9, %p1540_p12 }
 0x194   : > { %p1328_p1 = por %p1327_p11, %p1326_p5 }
 0x195   : > { %p1324_p0 = pneg %p1323_p2 }
 0x196   : > { %p1330_p6 = por %p1329_p4, %p1328_p1 }
 0x198   : > { %p1331_p8 = pnand %p1330_p6, %p1324_p0 }
 0x19a   : > { %1334 = shalt.err (!%p1331_p8)
}
 0x19b   : > { %s1419_s11 = smov 64   ;;  %s1420_s19 = smov 4  }
 0x19c   : > { %1184 = dma.vmem_to_hbm [thread:$0]  (%p1540_p12), %s1761_s6, 2048, %s1755_s26, %s798_s14, %s1419_s11, %s1419_s11, %s1420_s19  }
 0x19d   : > { %s803_s20 = scalar_lea.sflag [#allocation9], %s1588_s12  ;;  %s1335_s21 = scalar_lea.vmem %s1770_s25, 4096 }
 0x19e   : > { %p1336_p10 = scmp.ne.s32.totalorder %s1770_s25, %s1335_s21  ;;  %s1421_s23 = smov [#allocation8]  }
 0x19f   : > { %s1339_s9 = sshll.u32 %s1421_s23, 4  ;;  %s1340_s9 = int_to_ptr.vmem [resolvable:$false] %s1339_s9 }
 0x1a0   : > { %p1337_p13 = pnand %p1336_p10, %p1540_p12  ;;  %s1341_s28 = scalar_lea.vmem %s1340_s9, 8192 }
 0x1a1   : > { %p1342_p7 = scmp.lt.s32.totalorder %s1770_s25, %s1340_s9  ;;  %p1343_p9 = scmp.lt.s32.totalorder %s1341_s28, %s1335_s21 }
 0x1a2   : > { %p1338_p3 = pneg %p1337_p13 }
 0x1a3   : > { %p1344_p2 = por %p1343_p9, %p1342_p7 }
 0x1a5   : > { %p1345_p0 = pnand %p1344_p2, %p1338_p3 }
 0x1a7   : > { %1348 = shalt.err (!%p1345_p0)
}
 0x1a8   : > { %s1349_s6 = scalar_lea.hbm %s1768_s13, 4096  ;;  %s1353_s29 = scalar_lea.hbm %s1848_s4, 8192 }
 0x1a9   : > { %p1350_p5 = scmp.ne.s32.totalorder %s1768_s13, %s1349_s6  ;;  %p1354_p4 = scmp.lt.u32.totalorder %s1768_s13, %s1848_s4 }
 0x1aa   : > { %p1355_p6 = scmp.lt.u32.totalorder %s1353_s29, %s1349_s6  ;;  %p1357_p10 = scmp.lt.u32.totalorder %s1349_s6, %s1768_s13 }
 0x1ab   : > { %p1351_p11 = pnand %p1350_p5, %p1540_p12 }
 0x1ac   : > { %p1356_p8 = por %p1355_p6, %p1354_p4 }
 0x1ad   : > { %p1352_p1 = pneg %p1351_p11 }
 0x1ae   : > { %p1358_p13 = por %p1357_p10, %p1356_p8 }
 0x1b0   : > { %p1359_p3 = pnand %p1358_p13, %p1352_p1 }
 0x1b2   : > { %1362 = shalt.err (!%p1359_p3)
}
 0x1b3   : > { %s1422_s7 = smov 128   ;;  %s1423_s8 = smov 8  }
 0x1b4   : > { %1185 = dma.vmem_to_hbm [thread:$0]  (%p1540_p12), %s1770_s25, 4096, %s1768_s13, %s803_s20, %s1422_s7, %s1422_s7, %s1423_s8  }
 0x1b5 PF: > { %s847_s11 = sand.u32 1, %s1397_s15   ;;  %p1863_p7 = scmp.ne.s32.totalorder %s1853_s22, 0 }
 0x1b6   : > { %p1864_p9 = scmp.ge.s32.totalorder %s1409_s18, 2  ;;  %s848_s19 = scalar_lea.sflag [#allocation4], %s847_s11 }
 0x1b8   : > { %p1197_p2 = pnand %p1864_p9, %p1863_p7 }
 0x1ba   : > { %1388 = dma.done.wait (!%p1197_p2), %s848_s19, 2048  }
 0x1bb   : > { %1390 = vsyncadd (!%p1197_p2), %s848_s19, 4294965248  ;;  %s857_s21 = scalar_lea.sflag [#allocation9], %s847_s11 }
 0x1bc   : > { %1392 = dma.done.wait (!%p1197_p2), %s857_s21, 4096  }
 0x1bd   : > { %1394 = vsyncadd (!%p1197_p2), %s857_s21, 4294963200  ;;  %p22_p12 = scmp.ge.s32.totalorder %s1505_s27, 4   ;;  %s1865_s15 = smov %s1401_s16 }
 0x1be   : > { %s1866_s16 = smov %s1405_s17  ;;  %s1867_s17 = smov %s1536_s24 }
 0x1bf   : > { %s1868_s18 = smov %s1505_s27  ;;  %24 = sbr.rel (!%p22_p12) target bundleno = 8 (0x8), region = 98 }
 0x1c6   :  { %862 = vsyncpa [#allocation3], 1 }
 0x1c7   :  { %864 = vsyncpa [#allocation3 + $0x1], 1 }
 0x1c8   :  { %865 = vsyncpa [#allocation6], 1 }
 0x1c9   :  { %866 = vsyncpa [#allocation4], 1 }
 0x1ca   :  { %868 = vsyncpa [#allocation4 + $0x1], 1 }
 0x1cb   :  { %869 = vsyncpa [#allocation9], 1 }
 0x1cc   :  { %871 = vsyncpa [#allocation9 + $0x1], 1 }

</bundles_post_ra>
